<compile_context>
chip_gen: v7x
topology: tpu7x:2x2x1
jax: 0.10.0
libtpu: 0.0.40
codegen_flags: <defaults>
</compile_context>

<pallas_src>
import jax
import jax.numpy as jnp
from jax import lax
from jax.experimental import pallas as pl
from jax.experimental.pallas import tpu as pltpu


def _model_kernel(x1_ref, x2_ref, w1_ref, b1_ref, w2_ref, b2_ref, out_ref):
    # x1_ref, x2_ref : (1, 2)
    # w1_ref : (2, 3), b1_ref : (1, 3)   -- fc1, stored (in_features, out_features)
    # w2_ref : (3, 4), b2_ref : (1, 4)   -- fc2
    # out_ref: (2, 4)
    w1 = w1_ref[...]
    b1 = b1_ref[...]
    w2 = w2_ref[...]
    b2 = b2_ref[...]

    def two_linear_row(x):  # x: (1, 2) -> (1, 4), pure VPU broadcast-MACs
        y1 = x[:, 0:1] * w1[0:1, :] + x[:, 1:2] * w1[1:2, :] + b1          # (1, 3)
        y2 = (y1[:, 0:1] * w2[0:1, :]
              + y1[:, 1:2] * w2[1:2, :]
              + y1[:, 2:3] * w2[2:3, :]
              + b2)                                                         # (1, 4)
        return y2

    # The cat((x1, x2), dim=0) is realized as two static row writes.
    out_ref[0:1, :] = two_linear_row(x1_ref[...]).astype(out_ref.dtype)
    out_ref[1:2, :] = two_linear_row(x2_ref[...]).astype(out_ref.dtype)


def model_forward(x1, x2, w1, b1, w2, b2):
    """Forward pass of the PyTorch Model in a single Pallas call.

    Weights are stored as (in_features, out_features), i.e. transposed vs.
    PyTorch's (out, in) layout; biases are (1, out_features).
    """
    n_out = x1.shape[0] + x2.shape[0]   # 2
    d_out = w2.shape[1]                 # 4
    vmem = pl.BlockSpec(memory_space=pltpu.MemorySpace.VMEM)

    return pl.pallas_call(
        _model_kernel,
        out_shape=jax.ShapeDtypeStruct((n_out, d_out), jnp.float32),
        in_specs=[vmem] * 6,
        out_specs=vmem,
    )(x1, x2, w1, b1, w2, b2)


if __name__ == "__main__":
    key = jax.random.PRNGKey(0)
    k_x1, k_x2, k_w1, k_b1, k_w2, k_b2 = jax.random.split(key, 6)

    # Inputs (same shapes as the PyTorch script: torch.randn(1, 2) each).
    x1 = jax.random.normal(k_x1, (1, 2), dtype=jnp.float32)
    x2 = jax.random.normal(k_x2, (1, 2), dtype=jnp.float32)

    # Deterministic parameter init (Linear(2, 3) and Linear(3, 4)).
    w1 = jax.random.normal(k_w1, (2, 3), dtype=jnp.float32) * 0.5
    b1 = jax.random.normal(k_b1, (1, 3), dtype=jnp.float32) * 0.1
    w2 = jax.random.normal(k_w2, (3, 4), dtype=jnp.float32) * 0.5
    b2 = jax.random.normal(k_b2, (1, 4), dtype=jnp.float32) * 0.1

    out = model_forward(x1, x2, w1, b1, w2, b2)
    jax.block_until_ready(out)

    # Pure-JAX reference (sequential two-Linear formulation, like the module).
    x3_ref = jnp.concatenate([x1, x2], axis=0)
    y1_ref = jnp.dot(x3_ref, w1, precision=lax.Precision.HIGHEST) + b1
    y_ref = jnp.dot(y1_ref, w2, precision=lax.Precision.HIGHEST) + b2

    assert out.shape == (2, 4)
    assert jnp.allclose(out, y_ref, atol=1e-5, rtol=1e-5)

    print("KERNEL_OK")
</pallas_src>

<mosaic_0001>
module attributes {stable_mosaic.version = 11 : i64} {
  func.func @_model_kernel(%arg0: memref<1x2xf32, #tpu.memory_space<vmem>>, %arg1: memref<1x2xf32, #tpu.memory_space<vmem>>, %arg2: memref<2x3xf32, #tpu.memory_space<vmem>>, %arg3: memref<1x3xf32, #tpu.memory_space<vmem>>, %arg4: memref<3x4xf32, #tpu.memory_space<vmem>>, %arg5: memref<1x4xf32, #tpu.memory_space<vmem>>, %arg6: memref<2x4xf32, #tpu.memory_space<vmem>>) attributes {dimension_semantics = [], scalar_prefetch = 0 : i64, scratch_operands = 0 : i64, tpu.core_type = #tpu.core_type<tc>} {
    %c0 = arith.constant 0 : index
    %c0_0 = arith.constant 0 : index
    %0 = vector.load %arg2[%c0, %c0_0] : memref<2x3xf32, #tpu.memory_space<vmem>>, vector<2x3xf32>
    %c0_1 = arith.constant 0 : index
    %c0_2 = arith.constant 0 : index
    %1 = vector.load %arg3[%c0_1, %c0_2] : memref<1x3xf32, #tpu.memory_space<vmem>>, vector<1x3xf32>
    %c0_3 = arith.constant 0 : index
    %c0_4 = arith.constant 0 : index
    %2 = vector.load %arg4[%c0_3, %c0_4] : memref<3x4xf32, #tpu.memory_space<vmem>>, vector<3x4xf32>
    %c0_5 = arith.constant 0 : index
    %c0_6 = arith.constant 0 : index
    %3 = vector.load %arg5[%c0_5, %c0_6] : memref<1x4xf32, #tpu.memory_space<vmem>>, vector<1x4xf32>
    %c0_7 = arith.constant 0 : index
    %c0_8 = arith.constant 0 : index
    %4 = vector.load %arg0[%c0_7, %c0_8] : memref<1x2xf32, #tpu.memory_space<vmem>>, vector<1x2xf32>
    %5 = vector.extract_strided_slice %4 {offsets = [0, 0], sizes = [1, 1], strides = [1, 1]} : vector<1x2xf32> to vector<1x1xf32>
    %6 = vector.extract_strided_slice %0 {offsets = [0, 0], sizes = [1, 3], strides = [1, 1]} : vector<2x3xf32> to vector<1x3xf32>
    %7 = vector.broadcast %5 : vector<1x1xf32> to vector<1x3xf32>
    %8 = arith.mulf %7, %6 : vector<1x3xf32>
    %9 = vector.extract_strided_slice %4 {offsets = [0, 1], sizes = [1, 1], strides = [1, 1]} : vector<1x2xf32> to vector<1x1xf32>
    %10 = vector.extract_strided_slice %0 {offsets = [1, 0], sizes = [1, 3], strides = [1, 1]} : vector<2x3xf32> to vector<1x3xf32>
    %11 = vector.broadcast %9 : vector<1x1xf32> to vector<1x3xf32>
    %12 = arith.mulf %11, %10 : vector<1x3xf32>
    %13 = arith.addf %8, %12 : vector<1x3xf32>
    %14 = arith.addf %13, %1 : vector<1x3xf32>
    %15 = vector.extract_strided_slice %14 {offsets = [0, 0], sizes = [1, 1], strides = [1, 1]} : vector<1x3xf32> to vector<1x1xf32>
    %16 = vector.extract_strided_slice %2 {offsets = [0, 0], sizes = [1, 4], strides = [1, 1]} : vector<3x4xf32> to vector<1x4xf32>
    %17 = vector.broadcast %15 : vector<1x1xf32> to vector<1x4xf32>
    %18 = arith.mulf %17, %16 : vector<1x4xf32>
    %19 = vector.extract_strided_slice %14 {offsets = [0, 1], sizes = [1, 1], strides = [1, 1]} : vector<1x3xf32> to vector<1x1xf32>
    %20 = vector.extract_strided_slice %2 {offsets = [1, 0], sizes = [1, 4], strides = [1, 1]} : vector<3x4xf32> to vector<1x4xf32>
    %21 = vector.broadcast %19 : vector<1x1xf32> to vector<1x4xf32>
    %22 = arith.mulf %21, %20 : vector<1x4xf32>
    %23 = arith.addf %18, %22 : vector<1x4xf32>
    %24 = vector.extract_strided_slice %14 {offsets = [0, 2], sizes = [1, 1], strides = [1, 1]} : vector<1x3xf32> to vector<1x1xf32>
    %25 = vector.extract_strided_slice %2 {offsets = [2, 0], sizes = [1, 4], strides = [1, 1]} : vector<3x4xf32> to vector<1x4xf32>
    %26 = vector.broadcast %24 : vector<1x1xf32> to vector<1x4xf32>
    %27 = arith.mulf %26, %25 : vector<1x4xf32>
    %28 = arith.addf %23, %27 : vector<1x4xf32>
    %29 = arith.addf %28, %3 : vector<1x4xf32>
    %c0_9 = arith.constant 0 : index
    %c0_10 = arith.constant 0 : index
    %30 = vector.load %arg6[%c0_9, %c0_10] : memref<2x4xf32, #tpu.memory_space<vmem>>, vector<1x4xf32>
    tpu.vector_store %arg6[%c0_9, %c0_10], %29 {strides = array<i32>} : memref<2x4xf32, #tpu.memory_space<vmem>>, vector<1x4xf32>,
    %c0_11 = arith.constant 0 : index
    %c0_12 = arith.constant 0 : index
    %31 = vector.load %arg1[%c0_11, %c0_12] : memref<1x2xf32, #tpu.memory_space<vmem>>, vector<1x2xf32>
    %32 = vector.extract_strided_slice %31 {offsets = [0, 0], sizes = [1, 1], strides = [1, 1]} : vector<1x2xf32> to vector<1x1xf32>
    %33 = vector.extract_strided_slice %0 {offsets = [0, 0], sizes = [1, 3], strides = [1, 1]} : vector<2x3xf32> to vector<1x3xf32>
    %34 = vector.broadcast %32 : vector<1x1xf32> to vector<1x3xf32>
    %35 = arith.mulf %34, %33 : vector<1x3xf32>
    %36 = vector.extract_strided_slice %31 {offsets = [0, 1], sizes = [1, 1], strides = [1, 1]} : vector<1x2xf32> to vector<1x1xf32>
    %37 = vector.extract_strided_slice %0 {offsets = [1, 0], sizes = [1, 3], strides = [1, 1]} : vector<2x3xf32> to vector<1x3xf32>
    %38 = vector.broadcast %36 : vector<1x1xf32> to vector<1x3xf32>
    %39 = arith.mulf %38, %37 : vector<1x3xf32>
    %40 = arith.addf %35, %39 : vector<1x3xf32>
    %41 = arith.addf %40, %1 : vector<1x3xf32>
    %42 = vector.extract_strided_slice %41 {offsets = [0, 0], sizes = [1, 1], strides = [1, 1]} : vector<1x3xf32> to vector<1x1xf32>
    %43 = vector.extract_strided_slice %2 {offsets = [0, 0], sizes = [1, 4], strides = [1, 1]} : vector<3x4xf32> to vector<1x4xf32>
    %44 = vector.broadcast %42 : vector<1x1xf32> to vector<1x4xf32>
    %45 = arith.mulf %44, %43 : vector<1x4xf32>
    %46 = vector.extract_strided_slice %41 {offsets = [0, 1], sizes = [1, 1], strides = [1, 1]} : vector<1x3xf32> to vector<1x1xf32>
    %47 = vector.extract_strided_slice %2 {offsets = [1, 0], sizes = [1, 4], strides = [1, 1]} : vector<3x4xf32> to vector<1x4xf32>
    %48 = vector.broadcast %46 : vector<1x1xf32> to vector<1x4xf32>
    %49 = arith.mulf %48, %47 : vector<1x4xf32>
    %50 = arith.addf %45, %49 : vector<1x4xf32>
    %51 = vector.extract_strided_slice %41 {offsets = [0, 2], sizes = [1, 1], strides = [1, 1]} : vector<1x3xf32> to vector<1x1xf32>
    %52 = vector.extract_strided_slice %2 {offsets = [2, 0], sizes = [1, 4], strides = [1, 1]} : vector<3x4xf32> to vector<1x4xf32>
    %53 = vector.broadcast %51 : vector<1x1xf32> to vector<1x4xf32>
    %54 = arith.mulf %53, %52 : vector<1x4xf32>
    %55 = arith.addf %50, %54 : vector<1x4xf32>
    %56 = arith.addf %55, %3 : vector<1x4xf32>
    %c1 = arith.constant 1 : index
    %c0_13 = arith.constant 0 : index
    %57 = vector.load %arg6[%c1, %c0_13] : memref<2x4xf32, #tpu.memory_space<vmem>>, vector<1x4xf32>
    tpu.vector_store %arg6[%c1, %c0_13], %56 {strides = array<i32>} : memref<2x4xf32, #tpu.memory_space<vmem>>, vector<1x4xf32>,
    return
  }
}

</mosaic_0001>

<bundles_post_ra>
// kernel: tpu_custom_call.1
= control target key start
LH: loop header
LB: loop body
LE: loop exit
PB: predicated region body
PF: predicated region fallthrough
CT: control target
= control target key end

     0   :  { %11 = vsyncpa [#allocation3], 0  ;;  %s291_s0 = inlined_call_operand.hbm [shape: f32[1,2], index: 0, kind: input, shape index: {}]   ;;  %s292_s1 = inlined_call_operand.vmem [shape: f32[1,2], index: 1, kind: input, shape index: {}]   ;;  %s293_s2 = inlined_call_operand.vmem [shape: f32[2,3], index: 2, kind: input, shape index: {}]   ;;  %s294_s3 = inlined_call_operand.vmem [shape: f32[1,3], index: 3, kind: input, shape index: {}]   ;;  %s295_s4 = inlined_call_operand.vmem [shape: f32[3,4], index: 4, kind: input, shape index: {}]   ;;  %s296_s5 = inlined_call_operand.vmem [shape: f32[1,4], index: 5, kind: input, shape index: {}]   ;;  %s297_s6 = inlined_call_operand.hbm [shape: f32[2,4], index: 6, kind: output, shape index: {}]  }
   0x1   :  { %12 = vsyncpa [#allocation4], 0  ;;  %s212_s21 = smov [#allocation2]   ;;  %s164_s25 = scalar_lea.hbm %s291_s0, 16 }
   0x2   :  { %s19_s22 = sshll.u32 %s212_s21, 4  ;;  %p165_p0 = scmp.ne.s32.totalorder %s291_s0, %s164_s25  ;;  %s20_s22 = int_to_ptr.vmem [resolvable:$true] %s19_s22 }
   0x3   :  { %p168_p1 = scmp.lt.u32.totalorder %s164_s25, %s291_s0 }
   0x5   :  { %p170_p2 = pnand %p168_p1, %p165_p0 }
   0x7   :  { %173 = shalt.err (!%p170_p2)
}
   0x8   :  { %s174_s30 = scalar_lea.vmem %s20_s22, 16  ;;  %s178_s7 = scalar_lea.vmem %s20_s22, 32 }
   0x9   :  { %p175_p3 = scmp.ne.s32.totalorder %s20_s22, %s174_s30  ;;  %p179_p4 = scmp.lt.s32.totalorder %s20_s22, %s20_s22 }
   0xa   :  { %p180_p5 = scmp.lt.s32.totalorder %s178_s7, %s174_s30 }
   0xc   :  { %p181_p6 = por %p180_p5, %p179_p4 }
   0xe   :  { %p182_p7 = pnand %p181_p6, %p175_p3 }
  0x10   :  { %185 = shalt.err (!%p182_p7)
}
  0x11   :  { %22 = dma.hbm_to_vmem [thread:$0]  %s291_s0, 16, %s20_s22, [#allocation3]  }
  0x12   :  { %208 = dma.done.wait [#allocation3], 16  }
  0x13   :  { %209 = vsyncadd [#allocation3], 4294967280  ;;  %v213_v0 = vmov 1   ;;  %v214_v1 = vmov 0   ;;  %v40_v2 = vld [vmem:[#allocation2] sm:$0x1]  ;;  %v46_v4 = vlaneseq }
  0x14   :  { %156 = vset.pattern.permute.xlu0 %v213_v0  ;;  %157 = vset.pattern.permute.xlu1 %v214_v1  ;;  %v91_v3 = vld [vmem:[%s292_s1] sm:$0x1]  ;;  %v215_v27 = vmov 2   ;;  %vm89_vm0 = vcmask 24576  }
  0x15   :  { %43 = vperm.xlu1 %157, %v40_v2   ;;  %52 = vperm.xlu0 %156, %v40_v2   ;;  %v47_v5 = vshrl.u32 %v46_v4, 7  ;;  %v36_v8 = vld [vmem:[%s293_s2] sm:$0x3] }
  0x16   :  { %v37_v19 = vld [vmem:[%s294_s3] sm:$0x1] }
  0x17   :  { %v48_v6 = vsub.s32 0, %v47_v5  ;;  %v38_v28 = vld [vmem:[%s295_s4] sm:$0x7]  ;;  %s216_s4 = smov [#allocation5]  }
  0x18   :  { %v76_v31 = vrot.slane %v38_v28, 1  ;;  %v84_v35 = vrot.slane %v38_v28, 2  ;;  %v39_v42 = vld [vmem:[%s296_s5] sm:$0x1]  ;;  %s142_s16 = sshll.u32 %s216_s4, 4  ;;  %s143_s16 = int_to_ptr.vmem [resolvable:$true] %s142_s16 }
  0x19   :  { %94 = vperm.xlu1 %157, %v91_v3   ;;  %103 = vperm.xlu0 %156, %v91_v3   ;;  %s186_s17 = scalar_lea.vmem %s143_s16, 32  ;;  %p191_p9 = scmp.lt.s32.totalorder %s143_s16, %s143_s16 }
  0x1a   :  { %p187_p8 = scmp.ne.s32.totalorder %s143_s16, %s186_s17  ;;  %p192_p10 = scmp.lt.s32.totalorder %s186_s17, %s186_s17 }
  0x1c   :  { %p193_p11 = por %p192_p10, %p191_p9 }
  0x1d   :  { %159 = vset.pattern.permute.xlu1 %v213_v0  ;;  %158 = vset.pattern.permute.xlu0 %v214_v1 }
  0x1e   :  { %p194_p12 = pnand %p193_p11, %p187_p8 }
  0x94   :  { %v44_v7 = vpop.permute.xlu1 %43  ;;  %v53_v9 = vpop.permute.xlu0 %52 }
  0x95   :  { %v49_v10 = vrot.slane %v44_v7, %v48_v6  ;;  %v58_v11 = vrot.slane %v53_v9, %v48_v6 }
  0x97   :  { %v50_v12 = vmul.f32 %v49_v10, %v36_v8  ;;  %v59_v13 = vmul.f32 %v58_v11, %v36_v8 }
  0x98   :  { %v95_v14 = vpop.permute.xlu1 %94  ;;  %v104_v15 = vpop.permute.xlu0 %103 }
  0x99   :  { %v61_v16 = vrot.slane %v59_v13, 1  ;;  %v100_v17 = vrot.slane %v95_v14, %v48_v6  ;;  %v109_v18 = vrot.slane %v104_v15, %v48_v6 }
  0x9b   :  { %v63_v20 = vadd.f32 %v61_v16, %v50_v12  ;;  %v110_v21 = vmul.f32 %v109_v18, %v36_v8  ;;  %v101_v22 = vmul.f32 %v100_v17, %v36_v8 }
  0x9d   :  { %v112_v23 = vrot.slane %v110_v21, 1  ;;  %v64_v24 = vadd.f32 %v63_v20, %v37_v19 }
  0x9f   :  { %v114_v25 = vadd.f32 %v112_v23, %v101_v22  ;;  %72 = vperm.xlu1 %159, %v64_v24   ;;  %67 = vperm.xlu0 %158, %v64_v24  }
  0xa1   :  { %v115_v26 = vadd.f32 %v114_v25, %v37_v19 }
  0xa3   :  { %160 = vset.pattern.permute.xlu1 %v214_v1  ;;  %161 = vset.pattern.permute.xlu0 %v213_v0 }
  0xa4   :  { %118 = vperm.xlu1 %160, %v115_v26   ;;  %123 = vperm.xlu0 %161, %v115_v26  }
  0xa8   :  { %162 = vset.pattern.permute.xlu1 %v215_v27  ;;  %163 = vset.pattern.permute.xlu0 %v215_v27 }
  0xa9   :  { %81 = vperm.xlu1 %162, %v64_v24  }
  0xad   :  { %129 = vperm.xlu1 %162, %v115_v26  }
 0x11e   :  { %v73_v29 = vpop.permute.xlu1 %72  ;;  %v68_v30 = vpop.permute.xlu0 %67 }
 0x11f   :  { %v78_v33 = vmul.f32 %v76_v31, %v73_v29  ;;  %v70_v34 = vmul.f32 %v68_v30, %v38_v28 }
 0x121   :  { %v79_v38 = vadd.f32 %v78_v33, %v70_v34 }
 0x123   :  { %v119_v32 = vpop.permute.xlu1 %118  ;;  %v124_v36 = vpop.permute.xlu0 %123 }
 0x124   :  { %v121_v39 = vmul.f32 %v119_v32, %v38_v28  ;;  %v126_v40 = vmul.f32 %v124_v36, %v76_v31 }
 0x126   :  { %v127_v45 = vadd.f32 %v126_v40, %v121_v39 }
 0x128   :  { %v82_v37 = vpop.permute.xlu1 %81 }
 0x129   :  { %v86_v41 = vmul.f32 %v84_v35, %v82_v37 }
 0x12b   :  { %v87_v43 = vadd.f32 %v86_v41, %v79_v38 }
 0x12c   :  { %v130_v44 = vpop.permute.xlu1 %129 }
 0x12d   :  { %v88_v46 = vadd.f32 %v87_v43, %v39_v42  ;;  %v132_v47 = vmul.f32 %v130_v44, %v84_v35 }
 0x12f   :  { %v133_v48 = vadd.f32 %v132_v47, %v127_v45  ;;  %90 = vst.msk [vmem:[#allocation5] sm:$0x1] %vm89_vm0, %v88_v46 }
 0x131   :  { %v134_v49 = vadd.f32 %v133_v48, %v39_v42 }
 0x133   :  { %135 = vst.msk [vmem:[#allocation5 + $0x1] sm:$0x1] %vm89_vm0, %v134_v49 }
 0x134   :  { %197 = shalt.err (!%p194_p12)
}
 0x135   :  { %s198_s19 = scalar_lea.hbm %s297_s6, 32 }
 0x136   :  { %p199_p13 = scmp.ne.s32.totalorder %s297_s6, %s198_s19  ;;  %p202_p0 = scmp.lt.u32.totalorder %s198_s19, %s297_s6 }
 0x138   :  { %p204_p1 = pnand %p202_p0, %p199_p13 }
 0x13a   :  { %207 = shalt.err (!%p204_p1)
}
 0x13b   :  { %145 = dma.vmem_to_hbm [thread:$0]  %s143_s16, 32, %s297_s6, [#allocation4]  }
 0x13c   :  { %210 = dma.done.wait [#allocation4], 32  }
 0x13d   :  { %211 = vsyncadd [#allocation4], 4294967264 }
 0x13e   :  { %149 = vsyncpa [#allocation3], 1 }
 0x13f   :  { %150 = vsyncpa [#allocation4], 1 }

</bundles_post_ra>
